<compile_context>
chip_gen: v5e
topology: v5e:2x2
jax: 0.10.0
libtpu: 0.0.40
codegen_flags: <defaults>
</compile_context>

<pallas_src>
import functools

import jax
import jax.numpy as jnp
from jax import lax
from jax.experimental import pallas as pl
from jax.experimental.pallas import tpu as pltpu


def _round_up(x, m):
    return (x + m - 1) // m * m


def _simplenet_kernel(x_ref, w1_ref, b1_ref, w2_ref, b2_ref, o_ref, *, out_real):
    # Hidden layer: (tm, Fp) bf16 @ (Fp, Hd) bf16 -> f32 accumulation on the MXU.
    h = jnp.dot(x_ref[...], w1_ref[...], preferred_element_type=jnp.float32)
    h = jnp.maximum(h + b1_ref[...], 0.0)           # bias + ReLU in f32 (v5e-safe)

    # Output layer: (tm, Hd) bf16 @ (Hd, Op) bf16 -> f32.
    logits = jnp.dot(h.astype(jnp.bfloat16), w2_ref[...],
                     preferred_element_type=jnp.float32)
    logits = logits + b2_ref[...]

    # Mask lane-padding columns (>= out_real) with -inf so they cannot perturb
    # the softmax normalizer.
    col = lax.broadcasted_iota(jnp.int32, logits.shape, 1)
    logits = jnp.where(col < out_real, logits, -jnp.inf)

    # Numerically-stable log_softmax over a lane-dense 128-wide block.
    m = jnp.max(logits, axis=-1, keepdims=True)
    shifted = logits - m
    lse = jnp.log(jnp.sum(jnp.exp(shifted), axis=-1, keepdims=True))
    o_ref[...] = (shifted - lse).astype(o_ref.dtype)


def simplenet_forward(x, w1, b1, w2, b2, *, tm_max=1024):
    """x: [B, C, H, W] float32. w1: [F, H], b1: [H], w2: [H, O], b2: [O].
    Returns log-probabilities [B, O] (float32)."""
    B = x.shape[0]
    x_flat = x.reshape(B, -1)                       # x.view(x.size(0), -1)
    F_in = x_flat.shape[1]
    Hd = w1.shape[1]
    Od = w2.shape[1]

    # Lane/sublane-friendly padded sizes.  Hidden dim is intentionally left
    # unpadded (full-array minor blocks are legal); only the in-features (lane
    # dim of x/w1) and output classes (lane dim of logits) get padded.
    Fp = _round_up(F_in, 128)
    Op = _round_up(Od, 128)
    Bp = _round_up(B, 8)                            # sublane-aligned batch only

    # --- batch tile selection -------------------------------------------------
    tm = min(tm_max, Bp)
    if Bp >= 16:
        # Keep at least 2 grid steps once there is real work, so the "parallel"
        # batch axis can shard across v7x's two TensorCores (floor of 256 rows
        # per tile so per-step overhead stays amortized on v5e/v6e).
        tm = min(tm, max(256, _round_up(Bp // 2, 8)))
    # VMEM safety: keep the double-buffered bf16 x block under ~4 MiB per buffer
    # so even v5e's 16 MiB scoped-VMEM default has ample headroom.
    x_block_budget = 4 << 20
    tm_vmem_cap = max(8, (x_block_budget // (2 * Fp)) // 8 * 8)
    tm = min(tm, tm_vmem_cap)
    n_tiles = pl.cdiv(Bp, tm)                       # partial edge block is fine

    # --- operand preparation (bf16 streams, minimal extra HBM passes) ---------
    if (F_in == Fp) and (B == Bp):
        x_p = x_flat.astype(jnp.bfloat16)           # no padding copy needed
    else:
        # Fuse the bf16 cast into the single padding copy.  Padded input columns
        # are zero; padded batch rows are zero (finite output, sliced off).
        x_p = jnp.zeros((Bp, Fp), jnp.bfloat16).at[:B, :F_in].set(
            x_flat.astype(jnp.bfloat16))

    if F_in == Fp:
        w1_p = w1.astype(jnp.bfloat16)              # [Fp, Hd], hidden unpadded
    else:
        w1_p = jnp.zeros((Fp, Hd), jnp.bfloat16).at[:F_in, :].set(
            w1.astype(jnp.bfloat16))
    b1_p = b1.reshape(1, Hd).astype(jnp.float32)

    if Od == Op:
        w2_p = w2.astype(jnp.bfloat16)
        b2_p = b2.reshape(1, Od).astype(jnp.float32)
    else:
        # Zero weights/bias in padded class columns; they get masked to -inf
        # inside the kernel anyway.
        w2_p = jnp.zeros((Hd, Op), jnp.bfloat16).at[:, :Od].set(
            w2.astype(jnp.bfloat16))
        b2_p = jnp.zeros((1, Op), jnp.float32).at[:, :Od].set(b2.reshape(1, Od))

    kernel = functools.partial(_simplenet_kernel, out_real=Od)

    cost = pl.CostEstimate(
        flops=2 * Bp * (Fp * Hd + Hd * Op),
        transcendentals=Bp * (Op + 1),              # exp per logit + log per row
        bytes_accessed=(x_p.size * 2 + w1_p.size * 2 + b1_p.size * 4
                        + w2_p.size * 2 + b2_p.size * 4 + Bp * Op * 4),
    )

    out_p = pl.pallas_call(
        kernel,
        out_shape=jax.ShapeDtypeStruct((Bp, Op), jnp.float32),
        grid_spec=pltpu.PrefetchScalarGridSpec(
            num_scalar_prefetch=0,
            grid=(n_tiles,),
            in_specs=[
                pl.BlockSpec((tm, Fp), lambda i: (i, 0)),   # batch-tiled bf16 x
                pl.BlockSpec((Fp, Hd), lambda i: (0, 0)),   # weights VMEM-resident
                pl.BlockSpec((1, Hd), lambda i: (0, 0)),    # across all batch tiles
                pl.BlockSpec((Hd, Op), lambda i: (0, 0)),
                pl.BlockSpec((1, Op), lambda i: (0, 0)),
            ],
            out_specs=pl.BlockSpec((tm, Op), lambda i: (i, 0)),
        ),
        compiler_params=pltpu.CompilerParams(
            dimension_semantics=("parallel",),      # megacore-shardable batch axis
        ),
        cost_estimate=cost,
    )(x_p, w1_p, b1_p, w2_p, b2_p)

    # TODO(synk): for a steady-state inference loop, weights could additionally be
    # kept VMEM-resident across calls via a cross-call prefetch (P10) pattern.
    return out_p[:B, :Od]


def init_params(key, in_features, hidden_features, out_features):
    """Deterministic init mimicking torch.nn.Linear default U[-1/sqrt(fan_in), 1/sqrt(fan_in)].
    Weights are stored [in, out] (transpose of PyTorch layout)."""
    k1, k2, k3, k4 = jax.random.split(key, 4)
    bound1 = 1.0 / (in_features ** 0.5)
    bound2 = 1.0 / (hidden_features ** 0.5)
    w1 = jax.random.uniform(k1, (in_features, hidden_features), jnp.float32, -bound1, bound1)
    b1 = jax.random.uniform(k2, (hidden_features,), jnp.float32, -bound1, bound1)
    w2 = jax.random.uniform(k3, (hidden_features, out_features), jnp.float32, -bound2, bound2)
    b2 = jax.random.uniform(k4, (out_features,), jnp.float32, -bound2, bound2)
    return w1, b1, w2, b2


if __name__ == "__main__":
    key = jax.random.PRNGKey(0)
    kx, kp = jax.random.split(key)

    # Small shapes consistent with the module: batch=2, C=4, H=W=16 -> in_features=1024
    B, C, H, W = 2, 4, 16, 16
    in_features = C * H * W
    hidden_features = 32
    out_features = 10

    x = jax.random.normal(kx, (B, C, H, W), jnp.float32)
    w1, b1, w2, b2 = init_params(kp, in_features, hidden_features, out_features)

    out = simplenet_forward(x, w1, b1, w2, b2)
    out = jax.block_until_ready(out)

    # Reference check in plain JAX (f32; bf16 storage/operands in the kernel
    # means a relaxed tolerance).
    x_flat = x.reshape(B, -1)
    h_ref = jnp.maximum(x_flat @ w1 + b1, 0.0)
    logits_ref = h_ref @ w2 + b2
    ref = jax.nn.log_softmax(logits_ref, axis=-1)

    assert out.shape == (B, out_features)
    assert bool(jnp.all(jnp.isfinite(out)))
    assert jnp.allclose(out, ref, atol=5e-2, rtol=5e-2)
    # log-probs must normalize: sum(exp(logp)) == 1 per row
    assert jnp.allclose(jnp.sum(jnp.exp(out), axis=-1), 1.0, atol=1e-3)

    print("KERNEL_OK")
</pallas_src>

<mosaic_0001>
module attributes {stable_mosaic.version = 11 : i64} {
  func.func @_simplenet_kernel(%arg0: i32, %arg1: memref<8x1024xbf16, #tpu.memory_space<vmem>>, %arg2: memref<1024x32xbf16, #tpu.memory_space<vmem>>, %arg3: memref<1x32xf32, #tpu.memory_space<vmem>>, %arg4: memref<32x128xbf16, #tpu.memory_space<vmem>>, %arg5: memref<1x128xf32, #tpu.memory_space<vmem>>, %arg6: memref<8x128xf32, #tpu.memory_space<vmem>>) attributes {dimension_semantics = [#tpu.dimension_semantics<parallel>], iteration_bounds = array<i64: 1>, scalar_prefetch = 0 : i64, scratch_operands = 0 : i64, tpu.core_type = #tpu.core_type<tc>, window_params = [{transform_indices = @transform_0, window_bounds = array<i64: 8, 1024>}, {pipeline_mode = #tpu.pipeline_mode<synchronous>, transform_indices = @transform_1, window_bounds = array<i64: 1024, 32>}, {pipeline_mode = #tpu.pipeline_mode<synchronous>, transform_indices = @transform_2, window_bounds = array<i64: 1, 32>}, {pipeline_mode = #tpu.pipeline_mode<synchronous>, transform_indices = @transform_3, window_bounds = array<i64: 32, 128>}, {pipeline_mode = #tpu.pipeline_mode<synchronous>, transform_indices = @transform_4, window_bounds = array<i64: 1, 128>}, {transform_indices = @transform_5, window_bounds = array<i64: 8, 128>}]} {
    %c0 = arith.constant 0 : index
    %c0_0 = arith.constant 0 : index
    %0 = vector.load %arg1[%c0, %c0_0] : memref<8x1024xbf16, #tpu.memory_space<vmem>>, vector<8x1024xbf16>
    %c0_1 = arith.constant 0 : index
    %c0_2 = arith.constant 0 : index
    %1 = vector.load %arg2[%c0_1, %c0_2] : memref<1024x32xbf16, #tpu.memory_space<vmem>>, vector<1024x32xbf16>
    %cst = arith.constant dense<0.000000e+00> : vector<8x32xf32>
    %2 = tpu.matmul %0, %1, %cst {dimension_numbers = #tpu.dot_dimension_numbers<[1], [0], [0], [1], [0, 0, 1, 1], [], []>} : vector<8x1024xbf16>, vector<1024x32xbf16>, vector<8x32xf32> -> vector<8x32xf32>
    %c0_3 = arith.constant 0 : index
    %c0_4 = arith.constant 0 : index
    %3 = vector.load %arg3[%c0_3, %c0_4] : memref<1x32xf32, #tpu.memory_space<vmem>>, vector<1x32xf32>
    %4 = vector.broadcast %3 : vector<1x32xf32> to vector<8x32xf32>
    %5 = arith.addf %2, %4 : vector<8x32xf32>
    %cst_5 = arith.constant 0.000000e+00 : f32
    %6 = vector.broadcast %cst_5 : f32 to vector<8x32xf32>
    %7 = arith.maximumf %5, %6 : vector<8x32xf32>
    %8 = arith.truncf %7 : vector<8x32xf32> to vector<8x32xbf16>
    %c0_6 = arith.constant 0 : index
    %c0_7 = arith.constant 0 : index
    %9 = vector.load %arg4[%c0_6, %c0_7] : memref<32x128xbf16, #tpu.memory_space<vmem>>, vector<32x128xbf16>
    %cst_8 = arith.constant dense<0.000000e+00> : vector<8x128xf32>
    %10 = tpu.matmul %8, %9, %cst_8 {dimension_numbers = #tpu.dot_dimension_numbers<[1], [0], [0], [1], [0, 0, 1, 1], [], []>} : vector<8x32xbf16>, vector<32x128xbf16>, vector<8x128xf32> -> vector<8x128xf32>
    %c0_9 = arith.constant 0 : index
    %c0_10 = arith.constant 0 : index
    %11 = vector.load %arg5[%c0_9, %c0_10] : memref<1x128xf32, #tpu.memory_space<vmem>>, vector<1x128xf32>
    %12 = vector.broadcast %11 : vector<1x128xf32> to vector<8x128xf32>
    %13 = arith.addf %10, %12 : vector<8x128xf32>
    %14 = tpu.iota {dimensions = array<i32: 1>} : vector<8x128xi32>
    %c10_i32 = arith.constant 10 : i32
    %15 = vector.broadcast %c10_i32 : i32 to vector<8x128xi32>
    %16 = arith.cmpi slt, %14, %15 : vector<8x128xi32>
    %cst_11 = arith.constant 0xFF800000 : f32
    %17 = vector.broadcast %cst_11 : f32 to vector<8x128xf32>
    %18 = arith.select %16, %13, %17 : vector<8x128xi1>, vector<8x128xf32>
    %cst_12 = arith.constant dense<0xFF800000> : vector<8xf32>
    %19 = vector.multi_reduction <maximumf>, %18, %cst_12 [1] : vector<8x128xf32> to vector<8xf32>
    %20 = vector.shape_cast %19 : vector<8xf32> to vector<8x1xf32>
    %21 = vector.broadcast %20 : vector<8x1xf32> to vector<8x128xf32>
    %22 = arith.subf %18, %21 : vector<8x128xf32>
    %23 = math.exp %22 : vector<8x128xf32>
    %cst_13 = arith.constant dense<0.000000e+00> : vector<8xf32>
    %24 = vector.multi_reduction <add>, %23, %cst_13 [1] : vector<8x128xf32> to vector<8xf32>
    %25 = vector.shape_cast %24 : vector<8xf32> to vector<8x1xf32>
    %26 = math.log %25 : vector<8x1xf32>
    %27 = vector.broadcast %26 : vector<8x1xf32> to vector<8x128xf32>
    %28 = arith.subf %22, %27 : vector<8x128xf32>
    %c0_14 = arith.constant 0 : index
    %c0_15 = arith.constant 0 : index
    %29 = vector.load %arg6[%c0_14, %c0_15] : memref<8x128xf32, #tpu.memory_space<vmem>>, vector<8x128xf32>
    tpu.vector_store %arg6[%c0_14, %c0_15], %28 {strides = array<i32>} : memref<8x128xf32, #tpu.memory_space<vmem>>, vector<8x128xf32>,
    return
  }
  func.func @transform_0(%arg0: i32) -> (i32, i32) {
    %c0_i32 = arith.constant 0 : i32
    %c0_i32_0 = arith.constant 0 : i32
    return %arg0, %c0_i32 : i32, i32
  }
  func.func @transform_1(%arg0: i32) -> (i32, i32) {
    %c0_i32 = arith.constant 0 : i32
    %c0_i32_0 = arith.constant 0 : i32
    %c0_i32_1 = arith.constant 0 : i32
    return %c0_i32, %c0_i32_0 : i32, i32
  }
  func.func @transform_2(%arg0: i32) -> (i32, i32) {
    %c0_i32 = arith.constant 0 : i32
    %c0_i32_0 = arith.constant 0 : i32
    %c0_i32_1 = arith.constant 0 : i32
    return %c0_i32, %c0_i32_0 : i32, i32
  }
  func.func @transform_3(%arg0: i32) -> (i32, i32) {
    %c0_i32 = arith.constant 0 : i32
    %c0_i32_0 = arith.constant 0 : i32
    %c0_i32_1 = arith.constant 0 : i32
    return %c0_i32, %c0_i32_0 : i32, i32
  }
  func.func @transform_4(%arg0: i32) -> (i32, i32) {
    %c0_i32 = arith.constant 0 : i32
    %c0_i32_0 = arith.constant 0 : i32
    %c0_i32_1 = arith.constant 0 : i32
    return %c0_i32, %c0_i32_0 : i32, i32
  }
  func.func @transform_5(%arg0: i32) -> (i32, i32) {
    %c0_i32 = arith.constant 0 : i32
    %c0_i32_0 = arith.constant 0 : i32
    return %arg0, %c0_i32 : i32, i32
  }
}

</mosaic_0001>

<bundles_post_ra>
// kernel: tpu_custom_call.1
= control target key start
LH: loop header
LB: loop body
LE: loop exit
PB: predicated region body
PF: predicated region fallthrough
CT: control target
= control target key end

     0   :  { %s1358_s0 = inlined_call_operand.vmem [shape: bf16[8,1024], index: 0, kind: input, shape index: {}]   ;;  %s1359_s1 = inlined_call_operand.vmem [shape: bf16[1024,32], index: 1, kind: input, shape index: {}]   ;;  %s1360_s2 = inlined_call_operand.vmem [shape: f32[1,32], index: 2, kind: input, shape index: {}]   ;;  %s1361_s3 = inlined_call_operand.vmem [shape: bf16[32,128], index: 3, kind: input, shape index: {}]   ;;  %s1362_s4 = inlined_call_operand.vmem [shape: f32[1,128], index: 4, kind: input, shape index: {}]   ;;  %s1363_s5 = inlined_call_operand.hbm [shape: f32[8,128], index: 5, kind: output, shape index: {}]  }
   0x1   :  { %v1016_v0 = vld [vmem:[%s1359_s1 + $0x38] sm:$0xff]  ;;  %v1015_v4 = vld [vmem:[%s1359_s1 + $0x30] sm:$0xff]  ;;  %v1014_v8 = vld [vmem:[%s1359_s1 + $0x28] sm:$0xff] }
   0x2   :  { %v1024_v1 = vld [vmem:[%s1359_s1 + $0x78] sm:$0xff]  ;;  %570 = vmatpush.bf16.msra.mxu0 %v1016_v0  ;;  %v1023_v5 = vld [vmem:[%s1359_s1 + $0x70] sm:$0xff]  ;;  %v1022_v9 = vld [vmem:[%s1359_s1 + $0x68] sm:$0xff] }
   0x3   :  { %v1032_v2 = vld [vmem:[%s1359_s1 + $0xb8] sm:$0xff]  ;;  %583 = vmatpush.bf16.msra.mxu1 %v1024_v1  ;;  %v1031_v6 = vld [vmem:[%s1359_s1 + $0xb0] sm:$0xff]  ;;  %v1030_v10 = vld [vmem:[%s1359_s1 + $0xa8] sm:$0xff] }
   0x4   :  { %v1040_v3 = vld [vmem:[%s1359_s1 + $0xf8] sm:$0xff]  ;;  %596 = vmatpush.bf16.msra.mxu2 %v1032_v2  ;;  %v1039_v7 = vld [vmem:[%s1359_s1 + $0xf0] sm:$0xff]  ;;  %v1038_v11 = vld [vmem:[%s1359_s1 + $0xe8] sm:$0xff] }
   0x5   :  { %609 = vmatpush.bf16.msra.mxu3 %v1040_v3  ;;  %v1013_v12 = vld [vmem:[%s1359_s1 + $0x20] sm:$0xff]  ;;  %v1012_v16 = vld [vmem:[%s1359_s1 + $0x18] sm:$0xff]  ;;  %v1011_v20 = vld [vmem:[%s1359_s1 + $0x10] sm:$0xff] }
   0x6   :  { %571 = vmatpush.bf16.msra.mxu0 %v1015_v4  ;;  %v1021_v13 = vld [vmem:[%s1359_s1 + $0x60] sm:$0xff]  ;;  %v1020_v17 = vld [vmem:[%s1359_s1 + $0x58] sm:$0xff]  ;;  %v1019_v21 = vld [vmem:[%s1359_s1 + $0x50] sm:$0xff] }
   0x7   :  { %584 = vmatpush.bf16.msra.mxu1 %v1023_v5  ;;  %v1029_v14 = vld [vmem:[%s1359_s1 + $0xa0] sm:$0xff]  ;;  %v1028_v18 = vld [vmem:[%s1359_s1 + $0x98] sm:$0xff]  ;;  %v1027_v22 = vld [vmem:[%s1359_s1 + $0x90] sm:$0xff] }
   0x8   :  { %597 = vmatpush.bf16.msra.mxu2 %v1031_v6  ;;  %v1037_v15 = vld [vmem:[%s1359_s1 + $0xe0] sm:$0xff]  ;;  %v1036_v19 = vld [vmem:[%s1359_s1 + $0xd8] sm:$0xff]  ;;  %v1035_v23 = vld [vmem:[%s1359_s1 + $0xd0] sm:$0xff] }
   0x9   :  { %610 = vmatpush.bf16.msra.mxu3 %v1039_v7 }
   0xa   :  { %572 = vmatpush.bf16.msra.mxu0 %v1014_v8 }
   0xb   :  { %585 = vmatpush.bf16.msra.mxu1 %v1022_v9 }
   0xc   :  { %598 = vmatpush.bf16.msra.mxu2 %v1030_v10 }
   0xd   :  { %611 = vmatpush.bf16.msra.mxu3 %v1038_v11 }
   0xe   :  { %573 = vmatpush.bf16.msra.mxu0 %v1013_v12 }
   0xf   :  { %586 = vmatpush.bf16.msra.mxu1 %v1021_v13 }
  0x10   :  { %599 = vmatpush.bf16.msra.mxu2 %v1029_v14 }
  0x11   :  { %612 = vmatpush.bf16.msra.mxu3 %v1037_v15 }
  0x12   :  { %574 = vmatpush.bf16.msra.mxu0 %v1012_v16 }
  0x13   :  { %587 = vmatpush.bf16.msra.mxu1 %v1020_v17 }
  0x14   :  { %600 = vmatpush.bf16.msra.mxu2 %v1028_v18 }
  0x15   :  { %613 = vmatpush.bf16.msra.mxu3 %v1036_v19 }
  0x16   :  { %10 = vsyncpa [#allocation3], 0  ;;  %575 = vmatpush.bf16.msra.mxu0 %v1011_v20  ;;  %v1010_v24 = vld [vmem:[%s1359_s1 + $0x8] sm:$0xff]  ;;  %v22_v29 = vld [vmem:[%s1358_s0] sm:$0xff]  ;;  %vm696_vm0 = vcmask 261120   ;;  %s1108_s8 = smov [#allocation2]  }
  0x17   :  { %588 = vmatpush.bf16.msra.mxu1 %v1019_v21  ;;  %v1018_v25 = vld [vmem:[%s1359_s1 + $0x48] sm:$0xff]  ;;  %v1009_v30 = vld [vmem:[%s1359_s1] sm:$0xff]  ;;  %v162_v33 = vunpack.c.l.b16 %v22_v29  ;;  %v163_v37 = vunpack.c.h.b16 %v22_v29  ;;  %v1048_v38 = vld [vmem:[%s1359_s1 + $0x138] sm:$0xff]  ;;  %s733_s9 = sshll.u32 %s1108_s8, 4  ;;  %s734_s9 = int_to_ptr.vmem [resolvable:$true] %s733_s9 }
  0x18   :  { %v1026_v26 = vld [vmem:[%s1359_s1 + $0x88] sm:$0xff]  ;;  %601 = vmatpush.bf16.msra.mxu2 %v1027_v22  ;;  %v1017_v31 = vld [vmem:[%s1359_s1 + $0x40] sm:$0xff]  ;;  %v1056_v39 = vld [vmem:[%s1359_s1 + $0x178] sm:$0xff] }
  0x19   :  { %614 = vmatpush.bf16.msra.mxu3 %v1035_v23  ;;  %v1034_v27 = vld [vmem:[%s1359_s1 + $0xc8] sm:$0xff]  ;;  %v1025_v34 = vld [vmem:[%s1359_s1 + $0x80] sm:$0xff]  ;;  %v1064_v40 = vld [vmem:[%s1359_s1 + $0x1b8] sm:$0xff]  ;;  %v170_v43 = vpack.c.b16 %v162_v33, %v162_v33  ;;  %v171_v45 = vpack.c.b16 %v163_v37, %v163_v37 }
  0x1a   :  { %v23_v28 = vld [vmem:[%s1358_s0 + $0x8] sm:$0xff]  ;;  %576 = vmatpush.bf16.msra.mxu0 %v1010_v24  ;;  %v1033_v35 = vld [vmem:[%s1359_s1 + $0xc0] sm:$0xff]  ;;  %v1072_v41 = vld [vmem:[%s1359_s1 + $0x1f8] sm:$0xff] }
  0x1b   :  { %589 = vmatpush.bf16.msra.mxu1 %v1018_v25  ;;  %v164_v32 = vunpack.c.l.b16 %v23_v28  ;;  %v165_v36 = vunpack.c.h.b16 %v23_v28  ;;  %v1047_v46 = vld [vmem:[%s1359_s1 + $0x130] sm:$0xff]  ;;  %v1046_v50 = vld [vmem:[%s1359_s1 + $0x128] sm:$0xff]  ;;  %v1045_v54 = vld [vmem:[%s1359_s1 + $0x120] sm:$0xff] }
  0x1c   :  { %602 = vmatpush.bf16.msra.mxu2 %v1026_v26  ;;  %v1055_v47 = vld [vmem:[%s1359_s1 + $0x170] sm:$0xff]  ;;  %v1054_v51 = vld [vmem:[%s1359_s1 + $0x168] sm:$0xff]  ;;  %v1053_v55 = vld [vmem:[%s1359_s1 + $0x160] sm:$0xff] }
  0x1d   :  { %615 = vmatpush.bf16.msra.mxu3 %v1034_v27  ;;  %v172_v42 = vpack.c.b16 %v164_v32, %v164_v32  ;;  %v173_v44 = vpack.c.b16 %v165_v36, %v165_v36  ;;  %v1063_v48 = vld [vmem:[%s1359_s1 + $0x1b0] sm:$0xff]  ;;  %v1062_v52 = vld [vmem:[%s1359_s1 + $0x1a8] sm:$0xff]  ;;  %v1061_v56 = vld [vmem:[%s1359_s1 + $0x1a0] sm:$0xff] }
  0x1e   :  { %577 = vmatpush.bf16.msra.mxu0 %v1009_v30  ;;  %v1071_v49 = vld [vmem:[%s1359_s1 + $0x1f0] sm:$0xff]  ;;  %v1070_v53 = vld [vmem:[%s1359_s1 + $0x1e8] sm:$0xff]  ;;  %v1069_v57 = vld [vmem:[%s1359_s1 + $0x1e0] sm:$0xff] }
  0x1f   :  { %590 = vmatpush.bf16.msra.mxu1 %v1017_v31  ;;  %v1044_v58 = vld [vmem:[%s1359_s1 + $0x118] sm:$0xff]  ;;  %v1043_v62 = vld [vmem:[%s1359_s1 + $0x110] sm:$0xff]  ;;  %v1042_v2 = vld [vmem:[%s1359_s1 + $0x108] sm:$0xff] }
  0x20   :  { %603 = vmatpush.bf16.msra.mxu2 %v1025_v34  ;;  %v1052_v59 = vld [vmem:[%s1359_s1 + $0x158] sm:$0xff]  ;;  %v1051_v63 = vld [vmem:[%s1359_s1 + $0x150] sm:$0xff]  ;;  %v1050_v3 = vld [vmem:[%s1359_s1 + $0x148] sm:$0xff] }
  0x21   :  { %616 = vmatpush.bf16.msra.mxu3 %v1033_v35  ;;  %578 = vmatmul.bf16.vlgmr.msra.gmra.mxu0 %v170_v43  ;;  %v1060_v60 = vld [vmem:[%s1359_s1 + $0x198] sm:$0xff]  ;;  %v1059_v0 = vld [vmem:[%s1359_s1 + $0x190] sm:$0xff]  ;;  %v1058_v5 = vld [vmem:[%s1359_s1 + $0x188] sm:$0xff] }
  0x22   :  { %622 = vmatpush.bf16.msrb.mxu0 %v1048_v38  ;;  %591 = vmatmul.bf16.vlgmr.msra.gmra.mxu1 %v171_v45  ;;  %v1068_v61 = vld [vmem:[%s1359_s1 + $0x1d8] sm:$0xff]  ;;  %v1067_v1 = vld [vmem:[%s1359_s1 + $0x1d0] sm:$0xff]  ;;  %v1066_v6 = vld [vmem:[%s1359_s1 + $0x1c8] sm:$0xff] }
  0x23   :  { %635 = vmatpush.bf16.msrb.mxu1 %v1056_v39  ;;  %604 = vmatmul.bf16.vlgmr.msra.gmra.mxu2 %v172_v42  ;;  %v24_v4 = vld [vmem:[%s1358_s0 + $0x10] sm:$0xff]  ;;  %v25_v7 = vld [vmem:[%s1358_s0 + $0x18] sm:$0xff]  ;;  %v1041_v10 = vld [vmem:[%s1359_s1 + $0x100] sm:$0xff] }
  0x24   :  { %648 = vmatpush.bf16.msrb.mxu2 %v1064_v40  ;;  %617 = vmatmul.bf16.vlgmr.msra.gmra.mxu3 %v173_v44  ;;  %v166_v8 = vunpack.c.l.b16 %v24_v4  ;;  %v167_v9 = vunpack.c.h.b16 %v24_v4  ;;  %v1049_v11 = vld [vmem:[%s1359_s1 + $0x140] sm:$0xff]  ;;  %v168_v12 = vunpack.c.l.b16 %v25_v7  ;;  %v169_v13 = vunpack.c.h.b16 %v25_v7  ;;  %v1074_v20 = vld [vmem:[%s1361_s3 + $0x8] sm:$0xff] }
  0x25   :  { %661 = vmatpush.bf16.msrb.mxu3 %v1072_v41  ;;  %v1057_v14 = vld [vmem:[%s1359_s1 + $0x180] sm:$0xff] }
  0x26   :  { %623 = vmatpush.bf16.msrb.mxu0 %v1047_v46  ;;  %v1065_v15 = vld [vmem:[%s1359_s1 + $0x1c0] sm:$0xff]  ;;  %v174_v16 = vpack.c.b16 %v166_v8, %v166_v8  ;;  %v175_v17 = vpack.c.b16 %v167_v9, %v167_v9  ;;  %v176_v18 = vpack.c.b16 %v168_v12, %v168_v12  ;;  %v177_v19 = vpack.c.b16 %v169_v13, %v169_v13 }
  0x27   :  { %636 = vmatpush.bf16.msrb.mxu1 %v1055_v47  ;;  %v1073_v26 = vld [vmem:[%s1361_s3] sm:$0xff] }
  0x28   :  { %649 = vmatpush.bf16.msrb.mxu2 %v1063_v48  ;;  %v1076_v28 = vld [vmem:[%s1360_s2] ss:$0 sm:$0xff] }
  0x29   :  { %662 = vmatpush.bf16.msrb.mxu3 %v1071_v49  ;;  %v713_v49 = vlaneseq }
  0x2a   :  { %624 = vmatpush.bf16.msrb.mxu0 %v1046_v50 }
  0x2b   :  { %637 = vmatpush.bf16.msrb.mxu1 %v1054_v51  ;;  %v714_v50 = vand.u32 127, %v713_v49  ;;  %v1077_v51 = vld [vmem:[%s1362_s4] ss:$0 sm:$0xff]  ;;  %s735_s4 = sshll.u32 %s1363_s5, 4  ;;  %s736_s4 = int_to_ptr.hbm [resolvable:$true] %s735_s4 }
  0x2c   :  { %650 = vmatpush.bf16.msrb.mxu2 %v1062_v52 }
  0x2d   :  { %663 = vmatpush.bf16.msrb.mxu3 %v1070_v53  ;;  %vm715_vm1 = vcmp.lt.s32.totalorder %v714_v50, 10 }
  0x2e   :  { %625 = vmatpush.bf16.msrb.mxu0 %v1045_v54 }
  0x2f   :  { %638 = vmatpush.bf16.msrb.mxu1 %v1053_v55 }
  0x30   :  { %651 = vmatpush.bf16.msrb.mxu2 %v1061_v56 }
  0x31   :  { %664 = vmatpush.bf16.msrb.mxu3 %v1069_v57 }
  0x32   :  { %626 = vmatpush.bf16.msrb.mxu0 %v1044_v58 }
  0x33   :  { %639 = vmatpush.bf16.msrb.mxu1 %v1052_v59 }
  0x34   :  { %652 = vmatpush.bf16.msrb.mxu2 %v1060_v60 }
  0x35   :  { %665 = vmatpush.bf16.msrb.mxu3 %v1068_v61 }
  0x36   :  { %627 = vmatpush.bf16.msrb.mxu0 %v1043_v62 }
  0x37   :  { %640 = vmatpush.bf16.msrb.mxu1 %v1051_v63 }
  0x38   :  { %653 = vmatpush.bf16.msrb.mxu2 %v1059_v0 }
  0x39   :  { %666 = vmatpush.bf16.msrb.mxu3 %v1067_v1 }
  0x3a   :  { %628 = vmatpush.bf16.msrb.mxu0 %v1042_v2 }
  0x3b   :  { %641 = vmatpush.bf16.msrb.mxu1 %v1050_v3 }
  0x3c   :  { %654 = vmatpush.bf16.msrb.mxu2 %v1058_v5 }
  0x3d   :  { %667 = vmatpush.bf16.msrb.mxu3 %v1066_v6 }
  0x3e   :  { %629 = vmatpush.bf16.msrb.mxu0 %v1041_v10 }
  0x3f   :  { %642 = vmatpush.bf16.msrb.mxu1 %v1049_v11 }
  0x40   :  { %655 = vmatpush.bf16.msrb.mxu2 %v1057_v14 }
  0x41   :  { %668 = vmatpush.bf16.msrb.mxu3 %v1065_v15  ;;  %630 = vmatmul.bf16.vlgmr.msrb.gmra.mxu0 %v174_v16 }
  0x42   :  { %643 = vmatmul.bf16.vlgmr.msrb.gmra.mxu1 %v175_v17  ;;  %706 = vmatpush.bf16.msra.mxu0 %v1074_v20 }
  0x43   :  { %656 = vmatmul.bf16.vlgmr.msrb.gmra.mxu2 %v176_v18 }
  0x44   :  { %669 = vmatmul.bf16.vlgmr.msrb.gmra.mxu3 %v177_v19 }
  0x46   :  { %707 = vmatpush.bf16.msra.mxu0 %v1073_v26 }
  0x9e   :  { %v579_v21 = vpop.f32.mrf.mxu0 }
  0x9f   :  { %v592_v22 = vpop.f32.mrf.mxu1  ;;  %v580_v31 = vadd.f32 %v1076_v28, %v579_v21 }
  0xa1   :  { %v593_v32 = vadd.f32 %v592_v22, %v580_v31 }
  0xa6   :  { %v605_v23 = vpop.f32.mrf.mxu2  ;;  %v581_v25 = vpop.f32.mrf.mxu0 }
  0xa7   :  { %v618_v24 = vpop.f32.mrf.mxu3  ;;  %v594_v27 = vpop.f32.mrf.mxu1  ;;  %v606_v33 = vadd.f32 %v605_v23, %v593_v32 }
  0xa9   :  { %v619_v34 = vadd.f32 %v618_v24, %v606_v33 }
  0xae   :  { %v607_v29 = vpop.f32.mrf.mxu2 }
  0xaf   :  { %v620_v30 = vpop.f32.mrf.mxu3 }
  0xbe   :  { %v631_v35 = vpop.f32.mrf.mxu0 }
  0xbf   :  { %v644_v36 = vpop.f32.mrf.mxu1  ;;  %v632_v37 = vadd.f32 %v631_v35, %v619_v34 }
  0xc1   :  { %v645_v38 = vadd.f32 %v644_v36, %v632_v37 }
  0xc6   :  { %v657_v39 = vpop.f32.mrf.mxu2  ;;  %v633_v42 = vpop.f32.mrf.mxu0 }
  0xc7   :  { %v670_v40 = vpop.f32.mrf.mxu3  ;;  %v658_v41 = vadd.f32 %v657_v39, %v645_v38  ;;  %v646_v43 = vpop.f32.mrf.mxu1 }
  0xc9   :  { %v671_v44 = vadd.f32 %v670_v40, %v658_v41 }
  0xcb   :  { %v674_v45 = vmax.f32 %v671_v44, 0.0 }
  0xcd   :  { %v675_v46 = vpack.c.bf16 %v674_v45, %v674_v45 }
  0xce   :  { %v659_v47 = vpop.f32.mrf.mxu2 }
  0xcf   :  { %v672_v48 = vpop.f32.mrf.mxu3  ;;  %1008 = vmatmul.msk.bf16.vlgmr.msra.gmra.mxu0 %vm696_vm0, %v675_v46 }
 0x14c   :  { %v709_v52 = vpop.f32.mrf.mxu0 }
 0x14d   :  { %v710_v53 = vadd.f32 %v1077_v51, %v709_v52 }
 0x14f   :  { %v716_v54 = vsel %vm715_vm1, %v710_v53, -inf }
 0x150   :  { %717 = vmax.xlane.f32.xlu0 %v716_v54 }
 0x154   :  { %v711_v55 = vpop.f32.mrf.mxu0 }
 0x1c3   :  { %v718_v56 = vpop.xlane.xlu0 %717 }
 0x1c4   :  { %v719_v57 = vsub.f32 %v716_v54, %v718_v56 }
 0x1c6   :  { %v720_v58 = vmul.f32 1.442695, %v719_v57 }
 0x1c8   :  { %1078 = vpow2.f32 %v720_v58 }
 0x1ce   :  { %v1079_v59 = vpop.eup %1078 }
 0x1cf   :  { %722 = vadd.xlane.f32.xlu0 %v1079_v59 }
 0x242   :  { %v723_v60 = vpop.xlane.xlu0 %722 }
 0x243   :  { %1080 = vlog2.f32 %v723_v60 }
 0x249   :  { %v1081_v61 = vpop.eup %1080 }
 0x24a   :  { %v725_v62 = vmul.f32 0.6931472, %v1081_v61 }
 0x24c   :  { %v726_v63 = vsub.f32 %v719_v57, %v725_v62 }
 0x24e   :  { %727 = vst [vmem:[#allocation2] sm:$0xff] %v726_v63 }
 0x24f   :  { %738 = dma.vmem_to_hbm [thread:$0]  %s734_s9, 128, %s736_s4, [#allocation3]  }
 0x250   :  { %1106 = dma.done.wait [#allocation3], 128  }
 0x251   :  { %1107 = vsyncadd [#allocation3], 4294967168 }
 0x252   :  { %743 = vsyncpa [#allocation3], 1 }

</bundles_post_ra>
